<compile_context>
chip_gen: v7x
topology: tpu7x:2x2x1
jax: 0.10.0
libtpu: 0.0.40
codegen_flags: <defaults>
</compile_context>

<pallas_src>
import functools

import jax
import jax.numpy as jnp
from jax.experimental import pallas as pl
from jax.experimental.pallas import tpu as pltpu  # noqa: F401  (TPU backend)

_LANE = 128  # TPU lane width; last HBM-visible dim should be a multiple of this.


def _mlp_kernel(*refs, activation, compute_dtype):
    """Fused MLP: refs = (x, w0, b0, w1, b1, ..., wL, bL, out).

    Weights are (in, out); biases are (1, out). All layers are unrolled at
    trace time; intermediate activations stay in vregs/VMEM (never hit HBM).
    """
    x_ref = refs[0]
    o_ref = refs[-1]
    layer_refs = refs[1:-1]
    n_layers = len(layer_refs) // 2

    h = x_ref[...].astype(jnp.float32)
    for i in range(n_layers):
        w_ref = layer_refs[2 * i]
        b_ref = layer_refs[2 * i + 1]
        acc = jnp.dot(h.astype(compute_dtype),
                      w_ref[...].astype(compute_dtype),
                      preferred_element_type=jnp.float32)
        acc = acc + b_ref[...].astype(jnp.float32)      # (1, N) broadcasts over rows
        if i < n_layers - 1:
            if activation == "relu":
                acc = jnp.maximum(acc, 0.0)
            else:                                       # "tanh" -> EUP, fused
                acc = jnp.tanh(acc)
        h = acc
    # nn.Dropout sits before the final Linear; identity in eval mode.
    # TODO(synk): training-mode dropout.
    o_ref[...] = h.astype(o_ref.dtype)


def init_mlp_params(key, dims, *, weight_dtype=jnp.float32, lane=_LANE):
    """nn.Linear-style init (uniform +/- 1/sqrt(fan_in)).

    Returns params as a list of (w_t, b2d) with w_t already transposed to
    (in, out) and the FINAL layer zero-padded on its out-dim up to a multiple
    of `lane` (so the kernel's HBM write is lane-dense). Also returns the true
    output width so the wrapper can slice the padding off.
    """
    params = []
    last = len(dims) - 2
    for i in range(len(dims) - 1):
        key, kw, kb = jax.random.split(key, 3)
        fan_in, fan_out = dims[i], dims[i + 1]
        bound = float(fan_in) ** -0.5
        # PyTorch layout (out, in), transposed ONCE here -> off the hot path.
        w = jax.random.uniform(kw, (fan_out, fan_in), jnp.float32, -bound, bound)
        b = jax.random.uniform(kb, (fan_out,), jnp.float32, -bound, bound)
        w_t = w.T.astype(weight_dtype)            # (in, out)
        b2d = b.reshape(1, fan_out)               # biases stay f32 (f32 accumulate)
        if i == last:
            n_pad = ((fan_out + lane - 1) // lane) * lane
            if n_pad != fan_out:
                w_t = jnp.pad(w_t, ((0, 0), (0, n_pad - fan_out)))
                b2d = jnp.pad(b2d, ((0, 0), (0, n_pad - fan_out)))
        params.append((w_t, b2d))
    return params, dims[-1]


def mlp_forward(x, params, out_dim, *, activation="relu", dropout=0.1,
                compute_dtype=jnp.float32):
    """Matches MLP.forward: (Linear + act) * (L-1), Dropout (eval identity), Linear."""
    assert activation in ("relu", "tanh")
    del dropout  # inference-mode identity; see TODO in kernel.

    M = x.shape[0]
    n_pad = params[-1][0].shape[1]

    # Advisory cost estimate for XLA's scheduler.
    flops = 0
    transcendentals = 0
    bytes_accessed = x.size * x.dtype.itemsize + M * n_pad * x.dtype.itemsize
    for i, (w_t, b) in enumerate(params):
        k, n = w_t.shape
        flops += 2 * M * k * n
        bytes_accessed += w_t.size * w_t.dtype.itemsize + b.size * b.dtype.itemsize
        if activation == "tanh" and i < len(params) - 1:
            transcendentals += M * n

    kernel = functools.partial(_mlp_kernel, activation=activation,
                               compute_dtype=compute_dtype)
    flat_args = [x]
    for w_t, b in params:
        flat_args += [w_t, b]

    # No grid: single invocation, all operands VMEM-resident (total < 64 KiB).
    out_padded = pl.pallas_call(
        kernel,
        out_shape=jax.ShapeDtypeStruct((M, n_pad), x.dtype),
        cost_estimate=pl.CostEstimate(flops=flops,
                                      transcendentals=transcendentals,
                                      bytes_accessed=bytes_accessed),
    )(*flat_args)
    return out_padded[:, :out_dim]


if __name__ == "__main__":
    key = jax.random.PRNGKey(0)
    dims = [32, 64, 64, 16]          # MLP([32, 64, 64, 16])
    batch = 8

    key, kx = jax.random.split(key)
    x = jax.random.normal(kx, (batch, dims[0]), jnp.float32)

    params, out_dim = init_mlp_params(key, dims)

    # ---- ReLU path -------------------------------------------------------
    out = mlp_forward(x, params, out_dim, activation="relu", dropout=0.1)
    out = jax.block_until_ready(out)

    ref = x
    n_layers = len(params)
    for i, (w_t, b) in enumerate(params):
        ref = ref @ w_t + b
        if i < n_layers - 1:
            ref = jnp.maximum(ref, 0.0)
    ref = ref[:, :out_dim]

    assert out.shape == (batch, out_dim)
    assert jnp.allclose(out, ref, atol=1e-5, rtol=1e-5)

    # ---- tanh path (activation fused in-kernel) --------------------------
    out_t = mlp_forward(x, params, out_dim, activation="tanh", dropout=0.1)
    out_t = jax.block_until_ready(out_t)

    ref_t = x
    for i, (w_t, b) in enumerate(params):
        ref_t = ref_t @ w_t + b
        if i < n_layers - 1:
            ref_t = jnp.tanh(ref_t)
    ref_t = ref_t[:, :out_dim]

    assert out_t.shape == (batch, out_dim)
    assert jnp.allclose(out_t, ref_t, atol=1e-4, rtol=1e-4)

    print("KERNEL_OK")
</pallas_src>

<mosaic_0001>
module attributes {stable_mosaic.version = 11 : i64} {
  func.func @_mlp_kernel(%arg0: memref<8x32xf32, #tpu.memory_space<vmem>>, %arg1: memref<32x64xf32, #tpu.memory_space<vmem>>, %arg2: memref<1x64xf32, #tpu.memory_space<vmem>>, %arg3: memref<64x64xf32, #tpu.memory_space<vmem>>, %arg4: memref<1x64xf32, #tpu.memory_space<vmem>>, %arg5: memref<64x128xf32, #tpu.memory_space<vmem>>, %arg6: memref<1x128xf32, #tpu.memory_space<vmem>>, %arg7: memref<8x128xf32, #tpu.memory_space<vmem>>) attributes {dimension_semantics = [], scalar_prefetch = 0 : i64, scratch_operands = 0 : i64, tpu.core_type = #tpu.core_type<tc>} {
    %c0 = arith.constant 0 : index
    %c0_0 = arith.constant 0 : index
    %0 = vector.load %arg0[%c0, %c0_0] : memref<8x32xf32, #tpu.memory_space<vmem>>, vector<8x32xf32>
    %c0_1 = arith.constant 0 : index
    %c0_2 = arith.constant 0 : index
    %1 = vector.load %arg1[%c0_1, %c0_2] : memref<32x64xf32, #tpu.memory_space<vmem>>, vector<32x64xf32>
    %cst = arith.constant dense<0.000000e+00> : vector<8x64xf32>
    %2 = tpu.matmul %0, %1, %cst {dimension_numbers = #tpu.dot_dimension_numbers<[1], [0], [0], [1], [0, 0, 1, 1], [], []>} : vector<8x32xf32>, vector<32x64xf32>, vector<8x64xf32> -> vector<8x64xf32>
    %c0_3 = arith.constant 0 : index
    %c0_4 = arith.constant 0 : index
    %3 = vector.load %arg2[%c0_3, %c0_4] : memref<1x64xf32, #tpu.memory_space<vmem>>, vector<1x64xf32>
    %4 = vector.broadcast %3 : vector<1x64xf32> to vector<8x64xf32>
    %5 = arith.addf %2, %4 : vector<8x64xf32>
    %cst_5 = arith.constant 0.000000e+00 : f32
    %6 = vector.broadcast %cst_5 : f32 to vector<8x64xf32>
    %7 = arith.maximumf %5, %6 : vector<8x64xf32>
    %c0_6 = arith.constant 0 : index
    %c0_7 = arith.constant 0 : index
    %8 = vector.load %arg3[%c0_6, %c0_7] : memref<64x64xf32, #tpu.memory_space<vmem>>, vector<64x64xf32>
    %cst_8 = arith.constant dense<0.000000e+00> : vector<8x64xf32>
    %9 = tpu.matmul %7, %8, %cst_8 {dimension_numbers = #tpu.dot_dimension_numbers<[1], [0], [0], [1], [0, 0, 1, 1], [], []>} : vector<8x64xf32>, vector<64x64xf32>, vector<8x64xf32> -> vector<8x64xf32>
    %c0_9 = arith.constant 0 : index
    %c0_10 = arith.constant 0 : index
    %10 = vector.load %arg4[%c0_9, %c0_10] : memref<1x64xf32, #tpu.memory_space<vmem>>, vector<1x64xf32>
    %11 = vector.broadcast %10 : vector<1x64xf32> to vector<8x64xf32>
    %12 = arith.addf %9, %11 : vector<8x64xf32>
    %cst_11 = arith.constant 0.000000e+00 : f32
    %13 = vector.broadcast %cst_11 : f32 to vector<8x64xf32>
    %14 = arith.maximumf %12, %13 : vector<8x64xf32>
    %c0_12 = arith.constant 0 : index
    %c0_13 = arith.constant 0 : index
    %15 = vector.load %arg5[%c0_12, %c0_13] : memref<64x128xf32, #tpu.memory_space<vmem>>, vector<64x128xf32>
    %cst_14 = arith.constant dense<0.000000e+00> : vector<8x128xf32>
    %16 = tpu.matmul %14, %15, %cst_14 {dimension_numbers = #tpu.dot_dimension_numbers<[1], [0], [0], [1], [0, 0, 1, 1], [], []>} : vector<8x64xf32>, vector<64x128xf32>, vector<8x128xf32> -> vector<8x128xf32>
    %c0_15 = arith.constant 0 : index
    %c0_16 = arith.constant 0 : index
    %17 = vector.load %arg6[%c0_15, %c0_16] : memref<1x128xf32, #tpu.memory_space<vmem>>, vector<1x128xf32>
    %18 = vector.broadcast %17 : vector<1x128xf32> to vector<8x128xf32>
    %19 = arith.addf %16, %18 : vector<8x128xf32>
    %c0_17 = arith.constant 0 : index
    %c0_18 = arith.constant 0 : index
    %20 = vector.load %arg7[%c0_17, %c0_18] : memref<8x128xf32, #tpu.memory_space<vmem>>, vector<8x128xf32>
    tpu.vector_store %arg7[%c0_17, %c0_18], %19 {strides = array<i32>} : memref<8x128xf32, #tpu.memory_space<vmem>>, vector<8x128xf32>,
    return
  }
}

</mosaic_0001>

<bundles_post_ra>
// kernel: tpu_custom_call.1
= control target key start
LH: loop header
LB: loop body
LE: loop exit
PB: predicated region body
PF: predicated region fallthrough
CT: control target
= control target key end

     0   :  { %12 = vsyncpa [#allocation3], 0  ;;  %s730_s0 = inlined_call_operand.hbm [shape: f32[8,32], index: 0, kind: input, shape index: {}]   ;;  %s731_s1 = inlined_call_operand.hbm [shape: f32[32,64], index: 1, kind: input, shape index: {}]   ;;  %s732_s2 = inlined_call_operand.vmem [shape: f32[1,64], index: 2, kind: input, shape index: {}]   ;;  %s733_s3 = inlined_call_operand.hbm [shape: f32[64,64], index: 3, kind: input, shape index: {}]   ;;  %s734_s4 = inlined_call_operand.vmem [shape: f32[1,64], index: 4, kind: input, shape index: {}]   ;;  %s735_s5 = inlined_call_operand.hbm [shape: f32[64,128], index: 5, kind: input, shape index: {}]   ;;  %s736_s6 = inlined_call_operand.vmem [shape: f32[1,128], index: 6, kind: input, shape index: {}]   ;;  %s737_s7 = inlined_call_operand.hbm [shape: f32[8,128], index: 7, kind: output, shape index: {}]  }
   0x1   :  { %13 = vsyncpa [#allocation6], 0 }
   0x2   :  { %14 = vsyncpa [#allocation9], 0 }
   0x3   :  { %15 = vsyncpa [#allocation4], 0  ;;  %s599_s24 = smov [#allocation5]   ;;  %s481_s28 = scalar_lea.hbm %s731_s1, 512 }
   0x4   :  { %s31_s25 = sshll.u32 %s599_s24, 4  ;;  %p482_p0 = scmp.ne.s32.totalorder %s731_s1, %s481_s28  ;;  %s32_s25 = int_to_ptr.vmem [resolvable:$true] %s31_s25 }
   0x5   :  { %p485_p1 = scmp.lt.u32.totalorder %s481_s28, %s731_s1 }
   0x7   :  { %p487_p2 = pnand %p485_p1, %p482_p0 }
   0x9   :  { %490 = shalt.err (!%p487_p2)
}
   0xa   :  { %s491_s10 = scalar_lea.vmem %s32_s25, 512  ;;  %p496_p4 = scmp.lt.s32.totalorder %s32_s25, %s32_s25 }
   0xb   :  { %p492_p3 = scmp.ne.s32.totalorder %s32_s25, %s491_s10  ;;  %p497_p5 = scmp.lt.s32.totalorder %s491_s10, %s491_s10 }
   0xd   :  { %p498_p6 = por %p497_p5, %p496_p4 }
   0xf   :  { %p499_p7 = pnand %p498_p6, %p492_p3 }
  0x11   :  { %502 = shalt.err (!%p499_p7)
}
  0x12   :  { %s600_s11 = smov 128   ;;  %s601_s12 = smov 8  }
  0x13   :  { %37 = dma.hbm_to_vmem [thread:$0]  %s731_s1, 512, %s32_s25, [#allocation6], %s600_s11, %s600_s11, %s601_s12  }
  0x14   :  { %s602_s15 = smov [#allocation2]   ;;  %s603_s17 = smov [#allocation7]  }
  0x15   :  { %s22_s16 = sshll.u32 %s602_s15, 4  ;;  %s45_s18 = sshll.u32 %s603_s17, 4  ;;  %s23_s16 = int_to_ptr.vmem [resolvable:$true] %s22_s16  ;;  %s46_s18 = int_to_ptr.vmem [resolvable:$true] %s45_s18 }
  0x16   :  { %s503_s21 = scalar_lea.hbm %s730_s0, 128 }
  0x17   :  { %p504_p8 = scmp.ne.s32.totalorder %s730_s0, %s503_s21  ;;  %p507_p9 = scmp.lt.u32.totalorder %s503_s21, %s730_s0 }
  0x19   :  { %p509_p10 = pnand %p507_p9, %p504_p8 }
  0x1b   :  { %512 = shalt.err (!%p509_p10)
}
  0x1c   :  { %s513_s1 = scalar_lea.vmem %s23_s16, 128  ;;  %p518_p12 = scmp.lt.s32.totalorder %s23_s16, %s23_s16 }
  0x1d   :  { %p514_p11 = scmp.ne.s32.totalorder %s23_s16, %s513_s1  ;;  %p519_p13 = scmp.lt.s32.totalorder %s513_s1, %s513_s1 }
  0x1f   :  { %p520_p0 = por %p519_p13, %p518_p12 }
  0x21   :  { %p521_p1 = pnand %p520_p0, %p514_p11 }
  0x23   :  { %524 = shalt.err (!%p521_p1)
}
  0x24   :  { %25 = dma.hbm_to_vmem [thread:$0]  %s730_s0, 128, %s23_s16, [#allocation3]  }
  0x25   :  { %s525_s30 = scalar_lea.hbm %s733_s3, 1024 }
  0x26   :  { %p526_p2 = scmp.ne.s32.totalorder %s733_s3, %s525_s30  ;;  %p529_p3 = scmp.lt.u32.totalorder %s525_s30, %s733_s3 }
  0x28   :  { %p531_p4 = pnand %p529_p3, %p526_p2 }
  0x2a   :  { %534 = shalt.err (!%p531_p4)
}
  0x2b   :  { %s535_s14 = scalar_lea.vmem %s46_s18, 1024  ;;  %p540_p6 = scmp.lt.s32.totalorder %s46_s18, %s46_s18 }
  0x2c   :  { %p536_p5 = scmp.ne.s32.totalorder %s46_s18, %s535_s14  ;;  %p541_p7 = scmp.lt.s32.totalorder %s535_s14, %s535_s14 }
  0x2e   :  { %p542_p8 = por %p541_p7, %p540_p6 }
  0x30   :  { %p543_p9 = pnand %p542_p8, %p536_p5 }
  0x32   :  { %546 = shalt.err (!%p543_p9)
}
  0x33   :  { %51 = dma.hbm_to_vmem [thread:$0]  %s733_s3, 1024, %s46_s18, [#allocation6], %s600_s11, %s600_s11, %s601_s12  }
  0x34   :  { %s604_s16 = smov [#allocation8]   ;;  %s547_s21 = scalar_lea.hbm %s735_s5, 1024 }
  0x35   :  { %s59_s17 = sshll.u32 %s604_s16, 4  ;;  %p548_p10 = scmp.ne.s32.totalorder %s735_s5, %s547_s21  ;;  %s60_s17 = int_to_ptr.vmem [resolvable:$true] %s59_s17 }
  0x36   :  { %p551_p11 = scmp.lt.u32.totalorder %s547_s21, %s735_s5 }
  0x38   :  { %p553_p12 = pnand %p551_p11, %p548_p10 }
  0x3a   :  { %556 = shalt.err (!%p553_p12)
}
  0x3b   :  { %s557_s1 = scalar_lea.vmem %s60_s17, 1024  ;;  %p562_p0 = scmp.lt.s32.totalorder %s60_s17, %s60_s17 }
  0x3c   :  { %p558_p13 = scmp.ne.s32.totalorder %s60_s17, %s557_s1  ;;  %p563_p1 = scmp.lt.s32.totalorder %s557_s1, %s557_s1 }
  0x3e   :  { %p564_p2 = por %p563_p1, %p562_p0 }
  0x40   :  { %p565_p3 = pnand %p564_p2, %p558_p13 }
  0x42   :  { %568 = shalt.err (!%p565_p3)
}
  0x43   :  { %65 = dma.hbm_to_vmem [thread:$0]  %s735_s5, 1024, %s60_s17, [#allocation9], %s600_s11, %s600_s11, %s601_s12  }
  0x44   :  { %591 = dma.done.wait [#allocation3], 128  }
  0x45   :  { %592 = vsyncadd [#allocation3], 4294967168 }
  0x46   :  { %593 = dma.done.wait [#allocation6], 1536  }
  0x47   :  { %594 = vsyncadd [#allocation6], 4294965760 }
  0x48   :  { %595 = dma.done.wait [#allocation9], 1024  }
  0x49   :  { %596 = vsyncadd [#allocation9], 4294966272  ;;  %v605_v0 = vmov 0.0|0.0   ;;  %vm606_vm0 = vmmov 0   ;;  %v607_v1 = vmov 0.0   ;;  %v81_v2 = vld [vmem:[#allocation5] sm:$0xff] }
  0x4a   :  { %441 = vmatprep.subr.bf16.mxu0 %v605_v0  ;;  %400 = vmatprep.mubr.msk.f32.mxu0 %vm606_vm0, %v607_v1  ;;  %v82_v3 = vld [vmem:[#allocation5 + $0x8] sm:$0xff]  ;;  %v83_v4 = vld [vmem:[#allocation5 + $0x10] sm:$0xff]  ;;  %v84_v6 = vld [vmem:[#allocation5 + $0x18] sm:$0xff]  ;;  %vm92_vm1 = vcmask 261120   ;;  %vm182_vm2 = vcmask 523264   ;;  %s608_s28 = smov [#allocation10]  }
  0x4b   :  { %447 = vmatprep.subr.bf16.mxu1 %v605_v0  ;;  %419 = vmatprep.mubr.msk.f32.mxu1 %vm606_vm0, %v607_v1  ;;  %v442_v5 = vpack.c.bf16 %v82_v3, %v81_v2  ;;  %v167_v7 = vld [vmem:[#allocation7] sm:$0xff]  ;;  %v168_v8 = vld [vmem:[#allocation7 + $0x8] sm:$0xff]  ;;  %v169_v9 = vld [vmem:[#allocation7 + $0x10] sm:$0xff]  ;;  %v445_v11 = vpack.c.bf16 %v84_v6, %v83_v4  ;;  %s352_s29 = sshll.u32 %s608_s28, 4  ;;  %s353_s29 = int_to_ptr.vmem [resolvable:$true] %s352_s29 }
  0x4c   :  { %v170_v10 = vld [vmem:[#allocation7 + $0x18] sm:$0xff]  ;;  %v448_v12 = vpack.c.bf16 %v168_v8, %v167_v7  ;;  %v171_v14 = vld [vmem:[#allocation7 + $0x20] sm:$0xff]  ;;  %v172_v15 = vld [vmem:[#allocation7 + $0x28] sm:$0xff]  ;;  %s569_s30 = scalar_lea.vmem %s353_s29, 128  ;;  %p574_p5 = scmp.lt.s32.totalorder %s353_s29, %s353_s29 }
  0x4d   :  { %443 = vmatpush3.bf16.msra.mxu0 %v442_v5  ;;  %v451_v13 = vpack.c.bf16 %v170_v10, %v169_v9  ;;  %v80_v16 = vld [vmem:[#allocation2] sm:$0xff]  ;;  %v454_v17 = vpack.c.bf16 %v172_v15, %v171_v14  ;;  %v173_v18 = vld [vmem:[#allocation7 + $0x30] sm:$0xff]  ;;  %v257_v21 = vld [vmem:[#allocation8] sm:$0xff]  ;;  %p570_p4 = scmp.ne.s32.totalorder %s353_s29, %s569_s30  ;;  %p575_p6 = scmp.lt.s32.totalorder %s569_s30, %s569_s30 }
  0x4e   :  { %444 = vmatprep.subr.bf16.mxu0 %v605_v0  ;;  %449 = vmatpush3.bf16.msra.mxu1 %v448_v12  ;;  %v174_v19 = vld [vmem:[#allocation7 + $0x38] sm:$0xff]  ;;  %v258_v22 = vld [vmem:[#allocation8 + $0x8] sm:$0xff]  ;;  %v259_v23 = vld [vmem:[#allocation8 + $0x10] sm:$0xff] }
  0x4f   :  { %450 = vmatprep.subr.bf16.mxu1 %v605_v0  ;;  %v457_v20 = vpack.c.bf16 %v174_v19, %v173_v18  ;;  %v460_v24 = vpack.c.bf16 %v258_v22, %v257_v21  ;;  %v260_v25 = vld [vmem:[#allocation8 + $0x18] sm:$0xff]  ;;  %v261_v27 = vld [vmem:[#allocation8 + $0x20] sm:$0xff]  ;;  %v262_v28 = vld [vmem:[#allocation8 + $0x28] sm:$0xff]  ;;  %p576_p7 = por %p575_p6, %p574_p5 }
  0x50   :  { %v463_v26 = vpack.c.bf16 %v260_v25, %v259_v23  ;;  %v466_v29 = vpack.c.bf16 %v262_v28, %v261_v27  ;;  %v363_v30 = vld [vmem:[%s732_s2] ss:$0 sm:$0xff]  ;;  %v263_v35 = vld [vmem:[#allocation8 + $0x30] sm:$0xff] }
  0x51   :  { %446 = vmatpush3.bf16.msra.mxu0 %v445_v11  ;;  %v264_v36 = vld [vmem:[#allocation8 + $0x38] sm:$0xff]  ;;  %p577_p8 = pnand %p576_p7, %p570_p4 }
  0x52   :  { %459 = vmatprep.subr.bf16.mxu0 %v605_v0  ;;  %452 = vmatpush3.bf16.msra.mxu1 %v451_v13  ;;  %v469_v37 = vpack.c.bf16 %v264_v36, %v263_v35  ;;  %v365_v38 = vld [vmem:[%s734_s4] ss:$0 sm:$0xff] }
  0x53   :  { %453 = vmatprep.subr.bf16.mxu1 %v605_v0  ;;  %v367_v43 = vld [vmem:[%s736_s6] ss:$0 sm:$0xff] }
  0x54   :  { %401 = vmatmul.mubr.msk.f32.vlgmr.msra.gmra.mrb[0].mxu0 %vm92_vm1, %v80_v16 }
  0x55   :  { %438 = vmatprep.mubr.msk.f32.mxu0 %vm606_vm0, %v607_v1  ;;  %461 = vmatpush3.bf16.msra.mxu0 %v460_v24 }
  0x56   :  { %455 = vmatpush3.bf16.msra.mxu1 %v454_v17  ;;  %462 = vmatprep.subr.bf16.mxu0 %v605_v0 }
  0x57   :  { %456 = vmatprep.subr.bf16.mxu1 %v605_v0 }
  0x59   :  { %464 = vmatpush3.bf16.msra.mxu0 %v463_v26 }
  0x5a   :  { %458 = vmatpush3.bf16.msra.mxu1 %v457_v20  ;;  %465 = vmatprep.subr.bf16.mxu0 %v605_v0 }
  0x5d   :  { %467 = vmatpush3.bf16.msra.mxu0 %v466_v29 }
  0x5e   :  { %468 = vmatprep.subr.bf16.mxu0 %v605_v0 }
  0x61   :  { %470 = vmatpush3.bf16.msra.mxu0 %v469_v37 }
 0x127   :  { %v162_v31 = vpop.f32.mrb[0].mxu0 }
 0x128   :  { %v163_v32 = vadd.f32 %v363_v30, %v162_v31  ;;  %v402_v33 = vpop.f32.mrb[1].mxu0 }
 0x12a   :  { %v166_v34 = vmax.f32 %v163_v32, 0.0 }
 0x12c   :  { %420 = vmatmul.mubr.msk.f32.vlgmr.msra.gmra.mrb[0].mxu1 %vm182_vm2, %v166_v34 }
 0x1ff   :  { %v252_v39 = vpop.f32.mrb[0].mxu1 }
 0x200   :  { %v253_v40 = vadd.f32 %v365_v38, %v252_v39  ;;  %v421_v41 = vpop.f32.mrb[1].mxu1 }
 0x202   :  { %v256_v42 = vmax.f32 %v253_v40, 0.0 }
 0x204   :  { %439 = vmatmul.mubr.msk.f32.vlgmr.msra.gmra.mrb[2].mxu0 %vm182_vm2, %v256_v42 }
 0x2d7   :  { %v341_v44 = vpop.f32.mrb[2].mxu0 }
 0x2d8   :  { %v342_v45 = vadd.f32 %v367_v43, %v341_v44  ;;  %v440_v46 = vpop.f32.mrb[3].mxu0 }
 0x2da   :  { %345 = vst [vmem:[#allocation10] sm:$0xff] %v342_v45 }
 0x2db   :  { %580 = shalt.err (!%p577_p8)
}
 0x2dc   :  { %s581_s9 = scalar_lea.hbm %s737_s7, 128 }
 0x2dd   :  { %p582_p9 = scmp.ne.s32.totalorder %s737_s7, %s581_s9  ;;  %p585_p10 = scmp.lt.u32.totalorder %s581_s9, %s737_s7 }
 0x2df   :  { %p587_p11 = pnand %p585_p10, %p582_p9 }
 0x2e1   :  { %590 = shalt.err (!%p587_p11)
}
 0x2e2   :  { %355 = dma.vmem_to_hbm [thread:$0]  %s353_s29, 128, %s737_s7, [#allocation4]  }
 0x2e3   :  { %597 = dma.done.wait [#allocation4], 128  }
 0x2e4   :  { %598 = vsyncadd [#allocation4], 4294967168 }
 0x2e5   :  { %359 = vsyncpa [#allocation3], 1 }
 0x2e6   :  { %360 = vsyncpa [#allocation6], 1 }
 0x2e7   :  { %361 = vsyncpa [#allocation9], 1 }
 0x2e8   :  { %362 = vsyncpa [#allocation4], 1 }

</bundles_post_ra>
